<compile_context>
chip_gen: v7x
topology: tpu7x:2x2x1
jax: 0.10.0
libtpu: 0.0.40
codegen_flags: <defaults>
</compile_context>

<pallas_src>
import jax
import jax.numpy as jnp
from jax.experimental import pallas as pl
from jax.experimental.pallas import tpu as pltpu

LANE = 128                 # TPU lane width: pad feature dims to this for unmasked loads/stores
DEFAULT_TB = 256           # max batch tile (sweep 512-1024 on v5e/v6e at large batch if mem-bound)
NEG_BIG = -1e30            # bias for padded action columns -> exp underflows to exactly 0 (f32 only)
BF16_HIDDEN_MIN = 512      # auto-switch matmul inputs to bf16 once hidden dims reach this size
SINGLE_BUF_W_BYTES = 8 << 20   # single-buffer resident weights once they exceed this footprint


def _round_up(n: int, m: int) -> int:
    return ((n + m - 1) // m) * m


def _make_mlp_softmax_kernel(n_linear: int):
    """Kernel factory for an n_linear-layer MLP (+softmax). refs = (x, w1, b1, ..., wL, bL, probs)."""

    def kernel(*refs):
        x_ref = refs[0]
        probs_ref = refs[-1]
        h = x_ref[...]
        for i in range(n_linear):
            w_ref = refs[1 + 2 * i]
            b_ref = refs[2 + 2 * i]
            # MXU matmul with f32 accumulation; inputs may be bf16 at scale, bias always f32.
            h = jnp.dot(h.astype(w_ref.dtype), w_ref[...],
                        preferred_element_type=jnp.float32) + b_ref[...]
            if i < n_linear - 1:
                h = jnp.maximum(h, 0.0)        # relu between layers (not on the output)
        logits = h
        # Numerically-stable softmax over the (padded, lane-dense) action axis, all in f32.
        m = jnp.max(logits, axis=-1, keepdims=True)
        e = jnp.exp(logits - m)                # padded cols: exp(-1e30 - m) == 0 exactly
        denom = jnp.sum(e, axis=-1, keepdims=True)
        # Exact normalization (rows sum to 1 to f32 precision) — negligible cost, softmax is tiny
        # next to the matmuls and the divide has plenty of VPU/EUP slack.
        probs_ref[...] = (e / denom).astype(probs_ref.dtype)

    return kernel


def pad_params(params, *, matmul_dtype=None):
    """Pad weights/biases to lane-dense (128-multiple) shapes ONCE.

    Call at init / after each optimizer step — NOT inside the per-step forward — so the forward
    does not re-read/re-write every weight through HBM before the kernel launches.

    params: dict with w1..wL of shape (in, out) and b1..bL of shape (1, out).
    matmul_dtype: dtype for the MXU matmul inputs; defaults to bf16 at large hidden sizes,
                  f32 otherwise. Biases (incl. the -1e30 action-pad fill) always stay f32.
    """
    n = 0
    while f"w{n + 1}" in params:
        n += 1
    dims = [params["w1"].shape[0]] + [params[f"w{i}"].shape[1] for i in range(1, n + 1)]
    pdims = [_round_up(d, LANE) for d in dims]

    if matmul_dtype is None:
        hidden = dims[1:-1]
        matmul_dtype = (jnp.bfloat16 if (hidden and max(hidden) >= BF16_HIDDEN_MIN)
                        else jnp.float32)

    tensors = []
    for i in range(1, n + 1):
        d_in, d_out = dims[i - 1], dims[i]
        p_in, p_out = pdims[i - 1], pdims[i]
        w_p = (jnp.zeros((p_in, p_out), matmul_dtype)
               .at[:d_in, :d_out].set(params[f"w{i}"].astype(matmul_dtype)))
        if i == n:
            # Output layer: padded action columns get -1e30 so softmax gives them exactly 0.
            b_p = (jnp.full((1, p_out), NEG_BIG, jnp.float32)
                   .at[:, :d_out].set(params[f"b{i}"].astype(jnp.float32)))
        else:
            b_p = (jnp.zeros((1, p_out), jnp.float32)
                   .at[:, :d_out].set(params[f"b{i}"].astype(jnp.float32)))
        tensors += [w_p, b_p]

    return {
        "n_linear": n,
        "dims": tuple(dims),
        "padded_dims": tuple(pdims),
        "matmul_dtype": matmul_dtype,
        "tensors": tuple(tensors),
    }


def mlp_with_softmax_head(x, padded, *, tb=None, out_dtype=jnp.float32):
    """x: (batch, d_obs). padded: output of pad_params(). Returns softmax probs (batch, d_action).

    out_dtype=jnp.bfloat16 halves writeback bytes (helps most on v5e) if downstream tolerates it.
    """
    n = padded["n_linear"]
    dims, pdims = padded["dims"], padded["padded_dims"]
    mm_dtype = padded["matmul_dtype"]
    d_obs, d_action = dims[0], dims[-1]
    dp, ap = pdims[0], pdims[-1]

    batch = x.shape[0]
    # Adaptive batch tile: no 256-row padding at tiny batch; >=2 parallel steps (v7x megacore
    # split) once batch exceeds DEFAULT_TB.
    if tb is None:
        tb = min(DEFAULT_TB, _round_up(max(batch, 1), 8))
    bp = _round_up(batch, tb)
    nb = bp // tb

    xf = x.astype(mm_dtype)
    if (batch, d_obs) == (bp, dp):
        x_p = xf                                   # already lane-dense & tile-aligned: no copy
    else:
        x_p = jnp.zeros((bp, dp), mm_dtype).at[:batch, :d_obs].set(xf)

    w_item = jnp.dtype(mm_dtype).itemsize
    w_bytes = sum(pdims[i] * pdims[i + 1] for i in range(n)) * w_item
    b_bytes = sum(pdims[1:]) * 4
    # Constant-index weights are VMEM-resident; drop them to single buffering once they are big
    # enough for default double-buffering to matter (critical on v7x's 64 MiB VMEM at scale).
    single_buffer_weights = w_bytes > SINGLE_BUF_W_BYTES

    const0 = lambda i: (0, 0)   # weights/biases: same block every step -> VMEM-resident
    in_specs = [pl.BlockSpec((tb, dp), lambda i: (i, 0))]   # x: tiled over batch (2-deep default)
    # TODO(synk): if a profile shows exposed x DMA at scale, raise the x spec to
    # pipeline_mode=pl.Buffered(3).
    for li in range(n):
        d_in, d_out = pdims[li], pdims[li + 1]
        if single_buffer_weights:
            in_specs.append(pl.BlockSpec((d_in, d_out), const0, pipeline_mode=pl.Buffered(1)))
            in_specs.append(pl.BlockSpec((1, d_out), const0, pipeline_mode=pl.Buffered(1)))
        else:
            in_specs.append(pl.BlockSpec((d_in, d_out), const0))
            in_specs.append(pl.BlockSpec((1, d_out), const0))

    # Per-generation VMEM budget: actual footprint with headroom, capped at 48 MiB (v7x-safe).
    n_wbuf = 1 if single_buffer_weights else 2
    out_item = jnp.dtype(out_dtype).itemsize
    vmem_need = ((w_bytes + b_bytes) * n_wbuf
                 + tb * dp * w_item * 2          # x tile, double-buffered
                 + tb * ap * out_item * 2        # out tile, double-buffered
                 + tb * max(pdims[1:]) * 4 * 4)  # live f32 intermediates headroom
    vmem_limit = int(min(max(vmem_need * 2, 16 << 20), 48 << 20))

    # TODO(synk): for hidden dims >~4k, stop keeping all weights VMEM-resident — add a grid axis
    # tiling w2/w3 along N (or K with an f32 accumulator scratch + pl.when init/finalize).

    probs_p = pl.pallas_call(
        _make_mlp_softmax_kernel(n),
        out_shape=jax.ShapeDtypeStruct((bp, ap), out_dtype),
        grid=(nb,),
        in_specs=in_specs,
        out_specs=pl.BlockSpec((tb, ap), lambda i: (i, 0)),
        compiler_params=pltpu.CompilerParams(
            dimension_semantics=("parallel",),    # megacore batch split on v7x when nb >= 2
            vmem_limit_bytes=vmem_limit,
        ),
    )(x_p, *padded["tensors"])

    # Slice padded batch rows and padded action columns back off.
    return probs_p[:batch, :d_action]


def init_params(key, d_obs, d_hiddens, d_action):
    """Deterministic synthetic init matching nn.Linear shapes (stored transposed: (in, out))."""
    dims = [d_obs] + list(d_hiddens) + [d_action]
    params = {}
    keys = jax.random.split(key, len(dims) - 1)
    for i, (d_in, d_out) in enumerate(zip(dims[:-1], dims[1:]), start=1):
        kw, kb = jax.random.split(keys[i - 1])
        bound = 1.0 / jnp.sqrt(d_in)
        params[f"w{i}"] = jax.random.uniform(kw, (d_in, d_out), jnp.float32, -bound, bound)
        params[f"b{i}"] = jax.random.uniform(kb, (1, d_out), jnp.float32, -bound, bound)
    return params


def mlp_with_softmax_head_ref(x, params):
    """Pure-JAX reference for correctness checking."""
    n = 0
    while f"w{n + 1}" in params:
        n += 1
    h = x
    for i in range(1, n + 1):
        h = h @ params[f"w{i}"] + params[f"b{i}"]
        if i < n:
            h = jnp.maximum(h, 0.0)
    return jax.nn.softmax(h, axis=-1)


if __name__ == "__main__":
    key = jax.random.PRNGKey(0)
    kx, kp = jax.random.split(key)

    batch, d_obs, d_hiddens, d_action = 8, 16, [32, 32], 6
    x = jax.random.normal(kx, (batch, d_obs), jnp.float32)
    params = init_params(kp, d_obs, d_hiddens, d_action)

    padded = pad_params(params)                    # pad once (init / after optimizer step)
    probs = mlp_with_softmax_head(x, padded)
    probs = jax.block_until_ready(probs)

    ref = mlp_with_softmax_head_ref(x, params)
    assert probs.shape == (batch, d_action)
    assert jnp.allclose(probs, ref, atol=1e-3, rtol=1e-3), "mismatch vs reference"
    assert jnp.allclose(jnp.sum(probs, axis=-1), 1.0, atol=1e-4), "rows must sum to 1"

    print("KERNEL_OK")
</pallas_src>

<mosaic_0001>
module attributes {stable_mosaic.version = 11 : i64} {
  func.func @kernel(%arg0: i32, %arg1: memref<8x128xf32, #tpu.memory_space<vmem>>, %arg2: memref<128x128xf32, #tpu.memory_space<vmem>>, %arg3: memref<1x128xf32, #tpu.memory_space<vmem>>, %arg4: memref<128x128xf32, #tpu.memory_space<vmem>>, %arg5: memref<1x128xf32, #tpu.memory_space<vmem>>, %arg6: memref<128x128xf32, #tpu.memory_space<vmem>>, %arg7: memref<1x128xf32, #tpu.memory_space<vmem>>, %arg8: memref<8x128xf32, #tpu.memory_space<vmem>>) attributes {dimension_semantics = [#tpu.dimension_semantics<parallel>], iteration_bounds = array<i64: 1>, scalar_prefetch = 0 : i64, scratch_operands = 0 : i64, tpu.core_type = #tpu.core_type<tc>, window_params = [{transform_indices = @transform_0, window_bounds = array<i64: 8, 128>}, {pipeline_mode = #tpu.pipeline_mode<synchronous>, transform_indices = @transform_1, window_bounds = array<i64: 128, 128>}, {pipeline_mode = #tpu.pipeline_mode<synchronous>, transform_indices = @transform_2, window_bounds = array<i64: 1, 128>}, {pipeline_mode = #tpu.pipeline_mode<synchronous>, transform_indices = @transform_3, window_bounds = array<i64: 128, 128>}, {pipeline_mode = #tpu.pipeline_mode<synchronous>, transform_indices = @transform_4, window_bounds = array<i64: 1, 128>}, {pipeline_mode = #tpu.pipeline_mode<synchronous>, transform_indices = @transform_5, window_bounds = array<i64: 128, 128>}, {pipeline_mode = #tpu.pipeline_mode<synchronous>, transform_indices = @transform_6, window_bounds = array<i64: 1, 128>}, {transform_indices = @transform_7, window_bounds = array<i64: 8, 128>}]} {
    %c0 = arith.constant 0 : index
    %c0_0 = arith.constant 0 : index
    %0 = vector.load %arg1[%c0, %c0_0] : memref<8x128xf32, #tpu.memory_space<vmem>>, vector<8x128xf32>
    %c0_1 = arith.constant 0 : index
    %c0_2 = arith.constant 0 : index
    %1 = vector.load %arg2[%c0_1, %c0_2] : memref<128x128xf32, #tpu.memory_space<vmem>>, vector<128x128xf32>
    %cst = arith.constant dense<0.000000e+00> : vector<8x128xf32>
    %2 = tpu.matmul %0, %1, %cst {dimension_numbers = #tpu.dot_dimension_numbers<[1], [0], [0], [1], [0, 0, 1, 1], [], []>} : vector<8x128xf32>, vector<128x128xf32>, vector<8x128xf32> -> vector<8x128xf32>
    %c0_3 = arith.constant 0 : index
    %c0_4 = arith.constant 0 : index
    %3 = vector.load %arg3[%c0_3, %c0_4] : memref<1x128xf32, #tpu.memory_space<vmem>>, vector<1x128xf32>
    %4 = vector.broadcast %3 : vector<1x128xf32> to vector<8x128xf32>
    %5 = arith.addf %2, %4 : vector<8x128xf32>
    %cst_5 = arith.constant 0.000000e+00 : f32
    %6 = vector.broadcast %cst_5 : f32 to vector<8x128xf32>
    %7 = arith.maximumf %5, %6 : vector<8x128xf32>
    %c0_6 = arith.constant 0 : index
    %c0_7 = arith.constant 0 : index
    %8 = vector.load %arg4[%c0_6, %c0_7] : memref<128x128xf32, #tpu.memory_space<vmem>>, vector<128x128xf32>
    %cst_8 = arith.constant dense<0.000000e+00> : vector<8x128xf32>
    %9 = tpu.matmul %7, %8, %cst_8 {dimension_numbers = #tpu.dot_dimension_numbers<[1], [0], [0], [1], [0, 0, 1, 1], [], []>} : vector<8x128xf32>, vector<128x128xf32>, vector<8x128xf32> -> vector<8x128xf32>
    %c0_9 = arith.constant 0 : index
    %c0_10 = arith.constant 0 : index
    %10 = vector.load %arg5[%c0_9, %c0_10] : memref<1x128xf32, #tpu.memory_space<vmem>>, vector<1x128xf32>
    %11 = vector.broadcast %10 : vector<1x128xf32> to vector<8x128xf32>
    %12 = arith.addf %9, %11 : vector<8x128xf32>
    %cst_11 = arith.constant 0.000000e+00 : f32
    %13 = vector.broadcast %cst_11 : f32 to vector<8x128xf32>
    %14 = arith.maximumf %12, %13 : vector<8x128xf32>
    %c0_12 = arith.constant 0 : index
    %c0_13 = arith.constant 0 : index
    %15 = vector.load %arg6[%c0_12, %c0_13] : memref<128x128xf32, #tpu.memory_space<vmem>>, vector<128x128xf32>
    %cst_14 = arith.constant dense<0.000000e+00> : vector<8x128xf32>
    %16 = tpu.matmul %14, %15, %cst_14 {dimension_numbers = #tpu.dot_dimension_numbers<[1], [0], [0], [1], [0, 0, 1, 1], [], []>} : vector<8x128xf32>, vector<128x128xf32>, vector<8x128xf32> -> vector<8x128xf32>
    %c0_15 = arith.constant 0 : index
    %c0_16 = arith.constant 0 : index
    %17 = vector.load %arg7[%c0_15, %c0_16] : memref<1x128xf32, #tpu.memory_space<vmem>>, vector<1x128xf32>
    %18 = vector.broadcast %17 : vector<1x128xf32> to vector<8x128xf32>
    %19 = arith.addf %16, %18 : vector<8x128xf32>
    %cst_17 = arith.constant dense<0xFF800000> : vector<8xf32>
    %20 = vector.multi_reduction <maximumf>, %19, %cst_17 [1] : vector<8x128xf32> to vector<8xf32>
    %21 = vector.shape_cast %20 : vector<8xf32> to vector<8x1xf32>
    %22 = vector.broadcast %21 : vector<8x1xf32> to vector<8x128xf32>
    %23 = arith.subf %19, %22 : vector<8x128xf32>
    %24 = math.exp %23 : vector<8x128xf32>
    %cst_18 = arith.constant dense<0.000000e+00> : vector<8xf32>
    %25 = vector.multi_reduction <add>, %24, %cst_18 [1] : vector<8x128xf32> to vector<8xf32>
    %26 = vector.shape_cast %25 : vector<8xf32> to vector<8x1xf32>
    %27 = vector.broadcast %26 : vector<8x1xf32> to vector<8x128xf32>
    %28 = arith.divf %24, %27 : vector<8x128xf32>
    %c0_19 = arith.constant 0 : index
    %c0_20 = arith.constant 0 : index
    %29 = vector.load %arg8[%c0_19, %c0_20] : memref<8x128xf32, #tpu.memory_space<vmem>>, vector<8x128xf32>
    tpu.vector_store %arg8[%c0_19, %c0_20], %28 {strides = array<i32>} : memref<8x128xf32, #tpu.memory_space<vmem>>, vector<8x128xf32>,
    return
  }
  func.func @transform_0(%arg0: i32) -> (i32, i32) {
    %c0_i32 = arith.constant 0 : i32
    %c0_i32_0 = arith.constant 0 : i32
    return %arg0, %c0_i32 : i32, i32
  }
  func.func @transform_1(%arg0: i32) -> (i32, i32) {
    %c0_i32 = arith.constant 0 : i32
    %c0_i32_0 = arith.constant 0 : i32
    %c0_i32_1 = arith.constant 0 : i32
    return %c0_i32, %c0_i32_0 : i32, i32
  }
  func.func @transform_2(%arg0: i32) -> (i32, i32) {
    %c0_i32 = arith.constant 0 : i32
    %c0_i32_0 = arith.constant 0 : i32
    %c0_i32_1 = arith.constant 0 : i32
    return %c0_i32, %c0_i32_0 : i32, i32
  }
  func.func @transform_3(%arg0: i32) -> (i32, i32) {
    %c0_i32 = arith.constant 0 : i32
    %c0_i32_0 = arith.constant 0 : i32
    %c0_i32_1 = arith.constant 0 : i32
    return %c0_i32, %c0_i32_0 : i32, i32
  }
  func.func @transform_4(%arg0: i32) -> (i32, i32) {
    %c0_i32 = arith.constant 0 : i32
    %c0_i32_0 = arith.constant 0 : i32
    %c0_i32_1 = arith.constant 0 : i32
    return %c0_i32, %c0_i32_0 : i32, i32
  }
  func.func @transform_5(%arg0: i32) -> (i32, i32) {
    %c0_i32 = arith.constant 0 : i32
    %c0_i32_0 = arith.constant 0 : i32
    %c0_i32_1 = arith.constant 0 : i32
    return %c0_i32, %c0_i32_0 : i32, i32
  }
  func.func @transform_6(%arg0: i32) -> (i32, i32) {
    %c0_i32 = arith.constant 0 : i32
    %c0_i32_0 = arith.constant 0 : i32
    %c0_i32_1 = arith.constant 0 : i32
    return %c0_i32, %c0_i32_0 : i32, i32
  }
  func.func @transform_7(%arg0: i32) -> (i32, i32) {
    %c0_i32 = arith.constant 0 : i32
    %c0_i32_0 = arith.constant 0 : i32
    return %arg0, %c0_i32 : i32, i32
  }
}

</mosaic_0001>

<bundles_post_ra>
// kernel: tpu_custom_call.1
= control target key start
LH: loop header
LB: loop body
LE: loop exit
PB: predicated region body
PF: predicated region fallthrough
CT: control target
= control target key end

     0   :  { %12 = vsyncpa [#allocation3], 0  ;;  %s910_s0 = inlined_call_operand.hbm [shape: f32[8,128], index: 0, kind: input, shape index: {}]   ;;  %s911_s1 = inlined_call_operand.hbm [shape: f32[128,128], index: 1, kind: input, shape index: {}]   ;;  %s912_s2 = inlined_call_operand.vmem [shape: f32[1,128], index: 2, kind: input, shape index: {}]   ;;  %s913_s3 = inlined_call_operand.hbm [shape: f32[128,128], index: 3, kind: input, shape index: {}]   ;;  %s914_s4 = inlined_call_operand.vmem [shape: f32[1,128], index: 4, kind: input, shape index: {}]   ;;  %s915_s5 = inlined_call_operand.hbm [shape: f32[128,128], index: 5, kind: input, shape index: {}]   ;;  %s916_s6 = inlined_call_operand.vmem [shape: f32[1,128], index: 6, kind: input, shape index: {}]   ;;  %s917_s7 = inlined_call_operand.hbm [shape: f32[8,128], index: 7, kind: output, shape index: {}]  }
   0x1   :  { %13 = vsyncpa [#allocation6], 0 }
   0x2   :  { %14 = vsyncpa [#allocation9], 0 }
   0x3   :  { %15 = vsyncpa [#allocation4], 0  ;;  %s752_s24 = smov [#allocation5]   ;;  %s634_s28 = scalar_lea.hbm %s911_s1, 2048 }
   0x4   :  { %s31_s25 = sshll.u32 %s752_s24, 4  ;;  %p635_p0 = scmp.ne.s32.totalorder %s911_s1, %s634_s28  ;;  %s32_s25 = int_to_ptr.vmem [resolvable:$true] %s31_s25 }
   0x5   :  { %p638_p1 = scmp.lt.u32.totalorder %s634_s28, %s911_s1 }
   0x7   :  { %p640_p2 = pnand %p638_p1, %p635_p0 }
   0x9   :  { %643 = shalt.err (!%p640_p2)
}
   0xa   :  { %s644_s10 = scalar_lea.vmem %s32_s25, 2048  ;;  %p649_p4 = scmp.lt.s32.totalorder %s32_s25, %s32_s25 }
   0xb   :  { %p645_p3 = scmp.ne.s32.totalorder %s32_s25, %s644_s10  ;;  %p650_p5 = scmp.lt.s32.totalorder %s644_s10, %s644_s10 }
   0xd   :  { %p651_p6 = por %p650_p5, %p649_p4 }
   0xf   :  { %p652_p7 = pnand %p651_p6, %p645_p3 }
  0x11   :  { %655 = shalt.err (!%p652_p7)
}
  0x12   :  { %s753_s11 = smov 128   ;;  %s754_s12 = smov 8  }
  0x13   :  { %37 = dma.hbm_to_vmem [thread:$0]  %s911_s1, 2048, %s32_s25, [#allocation6], %s753_s11, %s753_s11, %s754_s12  }
  0x14   :  { %s755_s15 = smov [#allocation2]   ;;  %s756_s17 = smov [#allocation7]  }
  0x15   :  { %s22_s16 = sshll.u32 %s755_s15, 4  ;;  %s45_s18 = sshll.u32 %s756_s17, 4  ;;  %s23_s16 = int_to_ptr.vmem [resolvable:$true] %s22_s16  ;;  %s46_s18 = int_to_ptr.vmem [resolvable:$true] %s45_s18 }
  0x16   :  { %s656_s21 = scalar_lea.hbm %s910_s0, 128 }
  0x17   :  { %p657_p8 = scmp.ne.s32.totalorder %s910_s0, %s656_s21  ;;  %p660_p9 = scmp.lt.u32.totalorder %s656_s21, %s910_s0 }
  0x19   :  { %p662_p10 = pnand %p660_p9, %p657_p8 }
  0x1b   :  { %665 = shalt.err (!%p662_p10)
}
  0x1c   :  { %s666_s1 = scalar_lea.vmem %s23_s16, 128  ;;  %p671_p12 = scmp.lt.s32.totalorder %s23_s16, %s23_s16 }
  0x1d   :  { %p667_p11 = scmp.ne.s32.totalorder %s23_s16, %s666_s1  ;;  %p672_p13 = scmp.lt.s32.totalorder %s666_s1, %s666_s1 }
  0x1f   :  { %p673_p0 = por %p672_p13, %p671_p12 }
  0x21   :  { %p674_p1 = pnand %p673_p0, %p667_p11 }
  0x23   :  { %677 = shalt.err (!%p674_p1)
}
  0x24   :  { %25 = dma.hbm_to_vmem [thread:$0]  %s910_s0, 128, %s23_s16, [#allocation3]  }
  0x25   :  { %s678_s30 = scalar_lea.hbm %s913_s3, 2048 }
  0x26   :  { %p679_p2 = scmp.ne.s32.totalorder %s913_s3, %s678_s30  ;;  %p682_p3 = scmp.lt.u32.totalorder %s678_s30, %s913_s3 }
  0x28   :  { %p684_p4 = pnand %p682_p3, %p679_p2 }
  0x2a   :  { %687 = shalt.err (!%p684_p4)
}
  0x2b   :  { %s688_s14 = scalar_lea.vmem %s46_s18, 2048  ;;  %p693_p6 = scmp.lt.s32.totalorder %s46_s18, %s46_s18 }
  0x2c   :  { %p689_p5 = scmp.ne.s32.totalorder %s46_s18, %s688_s14  ;;  %p694_p7 = scmp.lt.s32.totalorder %s688_s14, %s688_s14 }
  0x2e   :  { %p695_p8 = por %p694_p7, %p693_p6 }
  0x30   :  { %p696_p9 = pnand %p695_p8, %p689_p5 }
  0x32   :  { %699 = shalt.err (!%p696_p9)
}
  0x33   :  { %51 = dma.hbm_to_vmem [thread:$0]  %s913_s3, 2048, %s46_s18, [#allocation6], %s753_s11, %s753_s11, %s754_s12  }
  0x34   :  { %s757_s16 = smov [#allocation8]   ;;  %s700_s21 = scalar_lea.hbm %s915_s5, 2048 }
  0x35   :  { %s59_s17 = sshll.u32 %s757_s16, 4  ;;  %p701_p10 = scmp.ne.s32.totalorder %s915_s5, %s700_s21  ;;  %s60_s17 = int_to_ptr.vmem [resolvable:$true] %s59_s17 }
  0x36   :  { %p704_p11 = scmp.lt.u32.totalorder %s700_s21, %s915_s5 }
  0x38   :  { %p706_p12 = pnand %p704_p11, %p701_p10 }
  0x3a   :  { %709 = shalt.err (!%p706_p12)
}
  0x3b   :  { %s710_s1 = scalar_lea.vmem %s60_s17, 2048  ;;  %p715_p0 = scmp.lt.s32.totalorder %s60_s17, %s60_s17 }
  0x3c   :  { %p711_p13 = scmp.ne.s32.totalorder %s60_s17, %s710_s1  ;;  %p716_p1 = scmp.lt.s32.totalorder %s710_s1, %s710_s1 }
  0x3e   :  { %p717_p2 = por %p716_p1, %p715_p0 }
  0x40   :  { %p718_p3 = pnand %p717_p2, %p711_p13 }
  0x42   :  { %721 = shalt.err (!%p718_p3)
}
  0x43   :  { %65 = dma.hbm_to_vmem [thread:$0]  %s915_s5, 2048, %s60_s17, [#allocation9], %s753_s11, %s753_s11, %s754_s12  }
  0x44   :  { %744 = dma.done.wait [#allocation3], 128  }
  0x45   :  { %745 = vsyncadd [#allocation3], 4294967168 }
  0x46   :  { %746 = dma.done.wait [#allocation6], 4096  }
  0x47   :  { %747 = vsyncadd [#allocation6], 4294963200 }
  0x48   :  { %748 = dma.done.wait [#allocation9], 2048  }
  0x49   :  { %749 = vsyncadd [#allocation9], 4294965248  ;;  %v758_v0 = vmov 0.0|0.0   ;;  %vm759_vm0 = vmmov 0   ;;  %v760_v1 = vmov 0.0   ;;  %v81_v2 = vld [vmem:[#allocation5] sm:$0xff] }
  0x4a   :  { %548 = vmatprep.subr.bf16.mxu0 %v758_v0  ;;  %475 = vmatprep.mubr.msk.f32.mxu0 %vm759_vm0, %v760_v1  ;;  %v82_v3 = vld [vmem:[#allocation5 + $0x8] sm:$0xff]  ;;  %v83_v4 = vld [vmem:[#allocation5 + $0x10] sm:$0xff]  ;;  %v84_v6 = vld [vmem:[#allocation5 + $0x18] sm:$0xff] }
  0x4b   :  { %572 = vmatprep.subr.bf16.mxu1 %v758_v0  ;;  %510 = vmatprep.mubr.msk.f32.mxu1 %vm759_vm0, %v760_v1  ;;  %v549_v5 = vpack.c.bf16 %v82_v3, %v81_v2  ;;  %v552_v7 = vpack.c.bf16 %v84_v6, %v83_v4  ;;  %v85_v8 = vld [vmem:[#allocation5 + $0x20] sm:$0xff]  ;;  %v86_v9 = vld [vmem:[#allocation5 + $0x28] sm:$0xff]  ;;  %v177_v12 = vld [vmem:[#allocation7 + $0x10] sm:$0xff] }
  0x4c   :  { %v175_v10 = vld [vmem:[#allocation7] sm:$0xff]  ;;  %v176_v11 = vld [vmem:[#allocation7 + $0x8] sm:$0xff]  ;;  %v178_v13 = vld [vmem:[#allocation7 + $0x18] sm:$0xff]  ;;  %v555_v14 = vpack.c.bf16 %v86_v9, %v85_v8 }
  0x4d   :  { %550 = vmatpush3.bf16.msra.mxu0 %v549_v5  ;;  %v573_v15 = vpack.c.bf16 %v176_v11, %v175_v10  ;;  %v87_v16 = vld [vmem:[#allocation5 + $0x30] sm:$0xff]  ;;  %v88_v17 = vld [vmem:[#allocation5 + $0x38] sm:$0xff]  ;;  %v576_v18 = vpack.c.bf16 %v178_v13, %v177_v12  ;;  %v179_v19 = vld [vmem:[#allocation7 + $0x20] sm:$0xff] }
  0x4e   :  { %551 = vmatprep.subr.bf16.mxu0 %v758_v0  ;;  %v180_v20 = vld [vmem:[#allocation7 + $0x28] sm:$0xff]  ;;  %v558_v21 = vpack.c.bf16 %v88_v17, %v87_v16  ;;  %v89_v22 = vld [vmem:[#allocation5 + $0x40] sm:$0xff]  ;;  %v181_v25 = vld [vmem:[#allocation7 + $0x30] sm:$0xff] }
  0x4f   :  { %574 = vmatpush3.bf16.msra.mxu1 %v573_v15  ;;  %v90_v23 = vld [vmem:[#allocation5 + $0x48] sm:$0xff]  ;;  %v579_v24 = vpack.c.bf16 %v180_v20, %v179_v19  ;;  %v182_v26 = vld [vmem:[#allocation7 + $0x38] sm:$0xff]  ;;  %v91_v28 = vld [vmem:[#allocation5 + $0x50] sm:$0xff] }
  0x50   :  { %575 = vmatprep.subr.bf16.mxu1 %v758_v0  ;;  %v561_v27 = vpack.c.bf16 %v90_v23, %v89_v22  ;;  %v92_v29 = vld [vmem:[#allocation5 + $0x58] sm:$0xff]  ;;  %v582_v30 = vpack.c.bf16 %v182_v26, %v181_v25  ;;  %v183_v31 = vld [vmem:[#allocation7 + $0x40] sm:$0xff]  ;;  %v184_v32 = vld [vmem:[#allocation7 + $0x48] sm:$0xff] }
  0x51   :  { %553 = vmatpush3.bf16.msra.mxu0 %v552_v7  ;;  %v564_v33 = vpack.c.bf16 %v92_v29, %v91_v28  ;;  %v93_v34 = vld [vmem:[#allocation5 + $0x60] sm:$0xff]  ;;  %v94_v35 = vld [vmem:[#allocation5 + $0x68] sm:$0xff]  ;;  %v585_v36 = vpack.c.bf16 %v184_v32, %v183_v31  ;;  %v185_v37 = vld [vmem:[#allocation7 + $0x50] sm:$0xff] }
  0x52   :  { %554 = vmatprep.subr.bf16.mxu0 %v758_v0  ;;  %v186_v38 = vld [vmem:[#allocation7 + $0x58] sm:$0xff]  ;;  %v567_v39 = vpack.c.bf16 %v94_v35, %v93_v34  ;;  %v95_v40 = vld [vmem:[#allocation5 + $0x70] sm:$0xff]  ;;  %v187_v43 = vld [vmem:[#allocation7 + $0x60] sm:$0xff] }
  0x53   :  { %577 = vmatpush3.bf16.msra.mxu1 %v576_v18  ;;  %v96_v41 = vld [vmem:[#allocation5 + $0x78] sm:$0xff]  ;;  %v588_v42 = vpack.c.bf16 %v186_v38, %v185_v37  ;;  %v188_v44 = vld [vmem:[#allocation7 + $0x68] sm:$0xff]  ;;  %v189_v48 = vld [vmem:[#allocation7 + $0x70] sm:$0xff] }
  0x54   :  { %578 = vmatprep.subr.bf16.mxu1 %v758_v0  ;;  %v570_v45 = vpack.c.bf16 %v96_v41, %v95_v40  ;;  %v591_v46 = vpack.c.bf16 %v188_v44, %v187_v43  ;;  %v80_v47 = vld [vmem:[#allocation2] sm:$0xff]  ;;  %v269_v51 = vld [vmem:[#allocation8] sm:$0xff]  ;;  %v270_v52 = vld [vmem:[#allocation8 + $0x8] sm:$0xff] }
  0x55   :  { %556 = vmatpush3.bf16.msra.mxu0 %v555_v14  ;;  %v190_v49 = vld [vmem:[#allocation7 + $0x78] sm:$0xff]  ;;  %v271_v53 = vld [vmem:[#allocation8 + $0x10] sm:$0xff]  ;;  %v597_v54 = vpack.c.bf16 %v270_v52, %v269_v51  ;;  %v273_v57 = vld [vmem:[#allocation8 + $0x20] sm:$0xff] }
  0x56   :  { %557 = vmatprep.subr.bf16.mxu0 %v758_v0  ;;  %v594_v50 = vpack.c.bf16 %v190_v49, %v189_v48  ;;  %v272_v55 = vld [vmem:[#allocation8 + $0x18] sm:$0xff]  ;;  %v274_v58 = vld [vmem:[#allocation8 + $0x28] sm:$0xff]  ;;  %v275_v60 = vld [vmem:[#allocation8 + $0x30] sm:$0xff] }
  0x57   :  { %580 = vmatpush3.bf16.msra.mxu1 %v579_v24  ;;  %v600_v56 = vpack.c.bf16 %v272_v55, %v271_v53  ;;  %v603_v59 = vpack.c.bf16 %v274_v58, %v273_v57  ;;  %v276_v61 = vld [vmem:[#allocation8 + $0x38] sm:$0xff]  ;;  %v277_v63 = vld [vmem:[#allocation8 + $0x40] sm:$0xff]  ;;  %v279_v3 = vld [vmem:[#allocation8 + $0x50] sm:$0xff] }
  0x58   :  { %581 = vmatprep.subr.bf16.mxu1 %v758_v0  ;;  %v606_v62 = vpack.c.bf16 %v276_v61, %v275_v60  ;;  %v280_v4 = vld [vmem:[#allocation8 + $0x58] sm:$0xff]  ;;  %v281_v6 = vld [vmem:[#allocation8 + $0x60] sm:$0xff]  ;;  %v282_v7 = vld [vmem:[#allocation8 + $0x68] sm:$0xff] }
  0x59   :  { %559 = vmatpush3.bf16.msra.mxu0 %v558_v21  ;;  %v612_v5 = vpack.c.bf16 %v280_v4, %v279_v3  ;;  %v615_v8 = vpack.c.bf16 %v282_v7, %v281_v6  ;;  %v389_v9 = vld [vmem:[%s912_s2] ss:$0 sm:$0xff]  ;;  %v283_v14 = vld [vmem:[#allocation8 + $0x70] sm:$0xff] }
  0x5a   :  { %560 = vmatprep.subr.bf16.mxu0 %v758_v0  ;;  %v284_v15 = vld [vmem:[#allocation8 + $0x78] sm:$0xff] }
  0x5b   :  { %583 = vmatpush3.bf16.msra.mxu1 %v582_v30  ;;  %v618_v16 = vpack.c.bf16 %v284_v15, %v283_v14  ;;  %v390_v17 = vld [vmem:[%s914_s4] ss:$0 sm:$0xff]  ;;  %s761_s4 = smov [#allocation10]  }
  0x5c   :  { %584 = vmatprep.subr.bf16.mxu1 %v758_v0  ;;  %v391_v21 = vld [vmem:[%s916_s6] ss:$0 sm:$0xff]  ;;  %s378_s28 = sshll.u32 %s761_s4, 4  ;;  %s379_s28 = int_to_ptr.vmem [resolvable:$true] %s378_s28 }
  0x5d   :  { %562 = vmatpush3.bf16.msra.mxu0 %v561_v27  ;;  %s722_s29 = scalar_lea.vmem %s379_s28, 128  ;;  %p727_p5 = scmp.lt.s32.totalorder %s379_s28, %s379_s28 }
  0x5e   :  { %563 = vmatprep.subr.bf16.mxu0 %v758_v0  ;;  %p723_p4 = scmp.ne.s32.totalorder %s379_s28, %s722_s29  ;;  %p728_p6 = scmp.lt.s32.totalorder %s722_s29, %s722_s29 }
  0x5f   :  { %586 = vmatpush3.bf16.msra.mxu1 %v585_v36 }
  0x60   :  { %587 = vmatprep.subr.bf16.mxu1 %v758_v0  ;;  %p729_p7 = por %p728_p6, %p727_p5 }
  0x61   :  { %565 = vmatpush3.bf16.msra.mxu0 %v564_v33 }
  0x62   :  { %566 = vmatprep.subr.bf16.mxu0 %v758_v0  ;;  %p730_p8 = pnand %p729_p7, %p723_p4 }
  0x63   :  { %589 = vmatpush3.bf16.msra.mxu1 %v588_v42 }
  0x64   :  { %590 = vmatprep.subr.bf16.mxu1 %v758_v0 }
  0x65   :  { %568 = vmatpush3.bf16.msra.mxu0 %v567_v39 }
  0x66   :  { %569 = vmatprep.subr.bf16.mxu0 %v758_v0 }
  0x67   :  { %592 = vmatpush3.bf16.msra.mxu1 %v591_v46 }
  0x68   :  { %593 = vmatprep.subr.bf16.mxu1 %v758_v0 }
  0x69   :  { %571 = vmatpush3.bf16.msra.mxu0 %v570_v45 }
  0x6a   :  { %596 = vmatprep.subr.bf16.mxu0 %v758_v0 }
  0x6b   :  { %595 = vmatpush3.bf16.msra.mxu1 %v594_v50 }
  0x6c   :  { %476 = vmatmul.mubr.f32.vlgmr.msra.gmra.mrb[0].mxu0 %v80_v47 }
  0x6d   :  { %545 = vmatprep.mubr.msk.f32.mxu0 %vm759_vm0, %v760_v1  ;;  %598 = vmatpush3.bf16.msra.mxu0 %v597_v54  ;;  %v278_v1 = vld [vmem:[#allocation8 + $0x48] sm:$0xff] }
  0x6e   :  { %599 = vmatprep.subr.bf16.mxu0 %v758_v0  ;;  %v609_v2 = vpack.c.bf16 %v278_v1, %v277_v63 }
  0x71   :  { %601 = vmatpush3.bf16.msra.mxu0 %v600_v56 }
  0x72   :  { %602 = vmatprep.subr.bf16.mxu0 %v758_v0 }
  0x75   :  { %604 = vmatpush3.bf16.msra.mxu0 %v603_v59 }
  0x76   :  { %605 = vmatprep.subr.bf16.mxu0 %v758_v0 }
  0x79   :  { %607 = vmatpush3.bf16.msra.mxu0 %v606_v62 }
  0x7a   :  { %608 = vmatprep.subr.bf16.mxu0 %v758_v0 }
  0x7d   :  { %610 = vmatpush3.bf16.msra.mxu0 %v609_v2 }
  0x7e   :  { %611 = vmatprep.subr.bf16.mxu0 %v758_v0 }
  0x81   :  { %613 = vmatpush3.bf16.msra.mxu0 %v612_v5 }
  0x82   :  { %614 = vmatprep.subr.bf16.mxu0 %v758_v0 }
  0x85   :  { %616 = vmatpush3.bf16.msra.mxu0 %v615_v8 }
  0x86   :  { %617 = vmatprep.subr.bf16.mxu0 %v758_v0 }
  0x89   :  { %619 = vmatpush3.bf16.msra.mxu0 %v618_v16 }
 0x13f   :  { %v170_v10 = vpop.f32.mrb[0].mxu0 }
 0x140   :  { %v171_v11 = vadd.f32 %v389_v9, %v170_v10  ;;  %v477_v12 = vpop.f32.mrb[1].mxu0 }
 0x142   :  { %v174_v13 = vmax.f32 %v171_v11, 0.0 }
 0x144   :  { %511 = vmatmul.mubr.f32.vlgmr.msra.gmra.mrb[0].mxu1 %v174_v13 }
 0x217   :  { %v264_v18 = vpop.f32.mrb[0].mxu1 }
 0x218   :  { %v265_v19 = vadd.f32 %v390_v17, %v264_v18  ;;  %v512_v0 = vpop.f32.mrb[1].mxu1 }
 0x21a   :  { %v268_v20 = vmax.f32 %v265_v19, 0.0 }
 0x21c   :  { %546 = vmatmul.mubr.f32.vlgmr.msra.gmra.mrb[2].mxu0 %v268_v20 }
 0x2ef   :  { %v358_v22 = vpop.f32.mrb[2].mxu0 }
 0x2f0   :  { %v359_v23 = vadd.f32 %v391_v21, %v358_v22  ;;  %v547_v24 = vpop.f32.mrb[3].mxu0 }
 0x2f2   :  { %362 = vmax.xlane.f32.xlu0 %v359_v23 }
 0x37f   :  { %v363_v25 = vpop.xlane.xlu0 %362 }
 0x380   :  { %v364_v26 = vsub.f32 %v359_v23, %v363_v25 }
 0x382   :  { %v365_v27 = vmul.f32 1.442695, %v364_v26 }
 0x384   :  { %630 = vpow2.f32 %v365_v27 }
 0x38e   :  { %v631_v28 = vpop.eup %630 }
 0x38f   :  { %367 = vadd.xlane.f32.xlu0 %v631_v28 }
 0x41c   :  { %v368_v29 = vpop.xlane.xlu0 %367 }
 0x41d   :  { %632 = vrcp.f32 %v368_v29 }
 0x427   :  { %v633_v30 = vpop.eup %632 }
 0x428   :  { %v370_v31 = vmul.f32 %v633_v30, %v631_v28 }
 0x42a   :  { %371 = vst [vmem:[#allocation10] sm:$0xff] %v370_v31 }
 0x42b   :  { %733 = shalt.err (!%p730_p8)
}
 0x42c   :  { %s734_s8 = scalar_lea.hbm %s917_s7, 128 }
 0x42d   :  { %p735_p9 = scmp.ne.s32.totalorder %s917_s7, %s734_s8  ;;  %p738_p10 = scmp.lt.u32.totalorder %s734_s8, %s917_s7 }
 0x42f   :  { %p740_p11 = pnand %p738_p10, %p735_p9 }
 0x431   :  { %743 = shalt.err (!%p740_p11)
}
 0x432   :  { %381 = dma.vmem_to_hbm [thread:$0]  %s379_s28, 128, %s917_s7, [#allocation4]  }
 0x433   :  { %750 = dma.done.wait [#allocation4], 128  }
 0x434   :  { %751 = vsyncadd [#allocation4], 4294967168 }
 0x435   :  { %385 = vsyncpa [#allocation3], 1 }
 0x436   :  { %386 = vsyncpa [#allocation6], 1 }
 0x437   :  { %387 = vsyncpa [#allocation9], 1 }
 0x438   :  { %388 = vsyncpa [#allocation4], 1 }

</bundles_post_ra>
